<compile_context>
chip_gen: v5e
topology: v5e:2x2
jax: 0.10.0
libtpu: 0.0.40
codegen_flags: <defaults>
</compile_context>

<pallas_src>
import jax
import jax.numpy as jnp
from jax.experimental import pallas as pl
from jax.experimental.pallas import tpu as pltpu


# ----------------------------- Pallas kernel ------------------------------- #

def fused_gcn_kernel(a_ref, x_ref, w_ref, b_ref, o_ref):
    """Fused 3x(GCNConv + BN(eval) + ReLU) + Linear over the whole graph.

    a_ref : (N, N)     normalized adjacency A_hat, f32
    x_ref : (N, H)     zero-padded node features, f32
    w_ref : (4, H, H)  packed bf16 weights [w1 | w2 | w3 | fc_w], BN folded
    b_ref : (8, H)     packed f32 biases, rows 0..3 = b1, b2, b3, fc_b
    o_ref : (N, H)     lane-dense output (valid data in column 0)
    """
    a = a_ref[...]
    b = b_ref[...]                                   # one small (8, H) load

    def gcn_bn_relu(h, i):
        # bf16-stored weights, upcast to f32: f32 accumulation + f32 VALU
        # elementwise path on every TPU generation (incl. v5e).
        w = w_ref[i].astype(jnp.float32)             # static first-axis slice
        xw = jnp.dot(h, w, preferred_element_type=jnp.float32)
        agg = jnp.dot(a, xw, preferred_element_type=jnp.float32) + b[i:i + 1, :]
        return jnp.maximum(agg, 0.0)                 # BN folded, dropout = id

    h = gcn_bn_relu(x_ref[...], 0)                   # conv1 + bn1 + relu
    h = gcn_bn_relu(h, 1)                            # conv2 + bn2 + relu
    h = gcn_bn_relu(h, 2)                            # conv3 + bn3 + relu
    fw = w_ref[3].astype(jnp.float32)
    o_ref[...] = (jnp.dot(h, fw, preferred_element_type=jnp.float32)
                  + b[3:4, :])                       # fc


# ------------------------------ Host helpers -------------------------------- #

LANE = 128


def _pad2d(x, rows, cols):
    out = jnp.zeros((rows, cols), x.dtype)
    return out.at[:x.shape[0], :x.shape[1]].set(x)


def _fold_bn(w, b, gamma, beta, mean, var, eps=1e-5):
    """Fold eval-mode BatchNorm1d into the preceding GCN weight/bias."""
    s = gamma * jax.lax.rsqrt(var + eps)             # (1, H) column scale
    return w * s, (b - mean) * s + beta


def pack_params(params, input_dim):
    """Fold BN, zero-pad to lane-aligned (H, H) tiles, pack into two slabs.

    Returns (w_slab bf16 (4,H,H), b_slab f32 (8,H), H, out_dim).  Packing is
    what cuts the pallas_call from 10 input DMAs to 4.
    """
    layers = params["gcn_layers"]
    H = layers[0]["w"].shape[1]
    out_dim = params["fc_w"].shape[1]
    fin_pad = pl.cdiv(input_dim, LANE) * LANE
    out_pad = pl.cdiv(out_dim, LANE) * LANE
    assert H % LANE == 0 and fin_pad == H and out_pad == H, (
        "packed (4, H, H) weight slab assumes hidden_dim == 128 and "
        "input/output feature dims <= 128")

    (w1, b1), (w2, b2), (w3, b3) = (
        _fold_bn(l["w"], l["b"], l["gamma"], l["beta"], l["mean"], l["var"])
        for l in layers)

    w_slab = jnp.stack([
        _pad2d(w1, H, H), w2, w3, _pad2d(params["fc_w"], H, H),
    ]).astype(jnp.bfloat16)                          # (4, H, H) bf16

    b_slab = jnp.zeros((8, H), jnp.float32)
    b_slab = b_slab.at[0:1].set(b1).at[1:2].set(b2).at[2:3].set(b3)
    b_slab = b_slab.at[3:4].set(_pad2d(params["fc_b"], 1, H))
    return w_slab, b_slab, H, out_dim


def gcn_forward(a_hat, x, params):
    """Full eval-mode forward: one ungridded pallas_call (everything resident
    in VMEM at this size; ~270 KiB working set, ~2.3 MFLOP)."""
    N = a_hat.shape[0]
    w_slab, b_slab, H, out_dim = pack_params(params, x.shape[1])
    x_p = _pad2d(x, N, H)

    flops = 2 * (N * H * H        # x @ w1 (padded to H wide)
                 + 3 * N * N * H  # three A_hat aggregations
                 + 2 * N * H * H  # h @ w2, h @ w3
                 + N * H * H)     # fc (padded to H wide)
    bytes_accessed = (a_hat.size * 4 + x_p.size * 4 + w_slab.size * 2
                      + b_slab.size * 4 + N * H * 4)

    vmem = pl.BlockSpec(memory_space=pltpu.MemorySpace.VMEM)
    out = pl.pallas_call(
        fused_gcn_kernel,
        out_shape=jax.ShapeDtypeStruct((N, H), jnp.float32),
        in_specs=[vmem] * 4,
        out_specs=vmem,
        cost_estimate=pl.CostEstimate(
            flops=flops, transcendentals=0, bytes_accessed=bytes_accessed),
    )(a_hat, x_p, w_slab, b_slab)
    return out[:, :out_dim]                          # lane-dense store, slice outside


# --------------------------- Graph / param setup ---------------------------- #

def build_normalized_adjacency(rate_mask, num_users, num_movies):
    """Dense A_hat = D^{-1/2}(A + I)D^{-1/2} with A[dst, src] = 1 for each
    rating edge user(src) -> movie(dst), matching the spec's DIRECTED
    edge_index = vstack([userId, movieId + num_users]) under PyG GCNConv
    (self-loops added, in-degree normalization)."""
    n = num_users + num_movies
    a = jnp.zeros((n, n), jnp.float32)
    a = a.at[num_users:, :num_users].set(rate_mask.T.astype(jnp.float32))
    a = a + jnp.eye(n, dtype=jnp.float32)            # self loops
    deg = a.sum(axis=1)                              # in-degree per dst
    dinv = jnp.where(deg > 0, jax.lax.rsqrt(deg), 0.0)
    return dinv[:, None] * a * dinv[None, :]


def init_params(key, input_dim, hidden_dim, output_dim):
    dims = [(input_dim, hidden_dim), (hidden_dim, hidden_dim),
            (hidden_dim, hidden_dim)]
    layers = []
    for fin, fout in dims:
        key, kw, kg, kb, km, kv = jax.random.split(key, 6)
        layers.append({
            "w": jax.random.normal(kw, (fin, fout), jnp.float32)
                 * (1.0 / jnp.sqrt(fin)),
            "b": jnp.zeros((1, fout), jnp.float32),
            "gamma": 1.0 + 0.1 * jax.random.normal(kg, (1, fout), jnp.float32),
            "beta": 0.1 * jax.random.normal(kb, (1, fout), jnp.float32),
            "mean": 0.1 * jax.random.normal(km, (1, fout), jnp.float32),
            "var": 1.0 + 0.1 * jax.random.uniform(kv, (1, fout), jnp.float32),
        })
    key, kfw = jax.random.split(key)
    return {
        "gcn_layers": layers,
        "fc_w": jax.random.normal(kfw, (hidden_dim, output_dim), jnp.float32)
                * (1.0 / jnp.sqrt(hidden_dim)),
        "fc_b": jnp.zeros((1, output_dim), jnp.float32),
    }


# ------------------------------ Reference ---------------------------------- #

def gcn_forward_ref(a_hat, x, params):
    """Plain-JAX f32 reference using the SAME packed parameters the kernel
    consumes (BN exactly folded; weights stored bf16 then upcast — the only
    numeric deviation from the f32 PyTorch model is that storage rounding),
    so the allclose check tightly validates the Pallas kernel's math."""
    N = a_hat.shape[0]
    w_slab, b_slab, H, out_dim = pack_params(params, x.shape[1])
    h = _pad2d(x, N, H)
    for i in range(3):
        h = a_hat @ (h @ w_slab[i].astype(jnp.float32)) + b_slab[i:i + 1, :]
        h = jnp.maximum(h, 0.0)
    out = h @ w_slab[3].astype(jnp.float32) + b_slab[3:4, :]
    return out[:, :out_dim]


# -------------------------------- Main -------------------------------------- #

if __name__ == "__main__":
    key = jax.random.PRNGKey(0)

    num_users, num_movies = 8, 8
    num_nodes = num_users + num_movies      # 16 graph nodes
    input_dim = 22                          # 20 genres + popularity + avg_rating
    hidden_dim = 128                        # matches the original spec
    output_dim = 1

    # Synthetic bipartite rating edges: user (src) -> movie (dst).
    key, k_edge = jax.random.split(key)
    rate_mask = jax.random.bernoulli(k_edge, 0.4, (num_users, num_movies))

    a_hat = build_normalized_adjacency(rate_mask, num_users, num_movies)

    # Node features: users are all-zero, movies have synthetic features.
    key, k_feat = jax.random.split(key)
    movie_feats = jax.random.normal(k_feat, (num_movies, input_dim), jnp.float32)
    node_features = jnp.concatenate(
        [jnp.zeros((num_users, input_dim), jnp.float32), movie_feats], axis=0)

    params = init_params(key, input_dim, hidden_dim, output_dim)

    forward = jax.jit(gcn_forward)          # keep the custom call inside a jit
    out = jax.block_until_ready(forward(a_hat, node_features, params))

    ref = gcn_forward_ref(a_hat, node_features, params)
    assert out.shape == (num_nodes, output_dim)
    assert jnp.allclose(out, ref, atol=1e-3, rtol=1e-3), "mismatch vs reference"

    print("KERNEL_OK")
</pallas_src>

<mosaic_0001>
module attributes {stable_mosaic.version = 11 : i64} {
  func.func @fused_gcn_kernel(%arg0: memref<16x16xf32, #tpu.memory_space<vmem>>, %arg1: memref<16x128xf32, #tpu.memory_space<vmem>>, %arg2: memref<4x128x128xbf16, #tpu.memory_space<vmem>>, %arg3: memref<8x128xf32, #tpu.memory_space<vmem>>, %arg4: memref<16x128xf32, #tpu.memory_space<vmem>>) attributes {dimension_semantics = [], scalar_prefetch = 0 : i64, scratch_operands = 0 : i64, tpu.core_type = #tpu.core_type<tc>} {
    %c0 = arith.constant 0 : index
    %c0_0 = arith.constant 0 : index
    %0 = vector.load %arg0[%c0, %c0_0] : memref<16x16xf32, #tpu.memory_space<vmem>>, vector<16x16xf32>
    %c0_1 = arith.constant 0 : index
    %c0_2 = arith.constant 0 : index
    %1 = vector.load %arg3[%c0_1, %c0_2] : memref<8x128xf32, #tpu.memory_space<vmem>>, vector<8x128xf32>
    %c0_3 = arith.constant 0 : index
    %c0_4 = arith.constant 0 : index
    %2 = vector.load %arg1[%c0_3, %c0_4] : memref<16x128xf32, #tpu.memory_space<vmem>>, vector<16x128xf32>
    %c0_5 = arith.constant 0 : index
    %c0_6 = arith.constant 0 : index
    %c0_7 = arith.constant 0 : index
    %3 = vector.load %arg2[%c0_5, %c0_6, %c0_7] : memref<4x128x128xbf16, #tpu.memory_space<vmem>>, vector<1x128x128xbf16>
    %4 = vector.shape_cast %3 : vector<1x128x128xbf16> to vector<128x128xbf16>
    %5 = arith.extf %4 : vector<128x128xbf16> to vector<128x128xf32>
    %cst = arith.constant dense<0.000000e+00> : vector<16x128xf32>
    %6 = tpu.matmul %2, %5, %cst {dimension_numbers = #tpu.dot_dimension_numbers<[1], [0], [0], [1], [0, 0, 1, 1], [], []>} : vector<16x128xf32>, vector<128x128xf32>, vector<16x128xf32> -> vector<16x128xf32>
    %cst_8 = arith.constant dense<0.000000e+00> : vector<16x128xf32>
    %7 = tpu.matmul %0, %6, %cst_8 {dimension_numbers = #tpu.dot_dimension_numbers<[1], [0], [0], [1], [0, 0, 1, 1], [], []>} : vector<16x16xf32>, vector<16x128xf32>, vector<16x128xf32> -> vector<16x128xf32>
    %8 = vector.extract_strided_slice %1 {offsets = [0, 0], sizes = [1, 128], strides = [1, 1]} : vector<8x128xf32> to vector<1x128xf32>
    %9 = vector.broadcast %8 : vector<1x128xf32> to vector<16x128xf32>
    %10 = arith.addf %7, %9 : vector<16x128xf32>
    %cst_9 = arith.constant 0.000000e+00 : f32
    %11 = vector.broadcast %cst_9 : f32 to vector<16x128xf32>
    %12 = arith.maximumf %10, %11 : vector<16x128xf32>
    %c1 = arith.constant 1 : index
    %c0_10 = arith.constant 0 : index
    %c0_11 = arith.constant 0 : index
    %13 = vector.load %arg2[%c1, %c0_10, %c0_11] : memref<4x128x128xbf16, #tpu.memory_space<vmem>>, vector<1x128x128xbf16>
    %14 = vector.shape_cast %13 : vector<1x128x128xbf16> to vector<128x128xbf16>
    %15 = arith.extf %14 : vector<128x128xbf16> to vector<128x128xf32>
    %cst_12 = arith.constant dense<0.000000e+00> : vector<16x128xf32>
    %16 = tpu.matmul %12, %15, %cst_12 {dimension_numbers = #tpu.dot_dimension_numbers<[1], [0], [0], [1], [0, 0, 1, 1], [], []>} : vector<16x128xf32>, vector<128x128xf32>, vector<16x128xf32> -> vector<16x128xf32>
    %cst_13 = arith.constant dense<0.000000e+00> : vector<16x128xf32>
    %17 = tpu.matmul %0, %16, %cst_13 {dimension_numbers = #tpu.dot_dimension_numbers<[1], [0], [0], [1], [0, 0, 1, 1], [], []>} : vector<16x16xf32>, vector<16x128xf32>, vector<16x128xf32> -> vector<16x128xf32>
    %18 = vector.extract_strided_slice %1 {offsets = [1, 0], sizes = [1, 128], strides = [1, 1]} : vector<8x128xf32> to vector<1x128xf32>
    %19 = vector.broadcast %18 : vector<1x128xf32> to vector<16x128xf32>
    %20 = arith.addf %17, %19 : vector<16x128xf32>
    %cst_14 = arith.constant 0.000000e+00 : f32
    %21 = vector.broadcast %cst_14 : f32 to vector<16x128xf32>
    %22 = arith.maximumf %20, %21 : vector<16x128xf32>
    %c2 = arith.constant 2 : index
    %c0_15 = arith.constant 0 : index
    %c0_16 = arith.constant 0 : index
    %23 = vector.load %arg2[%c2, %c0_15, %c0_16] : memref<4x128x128xbf16, #tpu.memory_space<vmem>>, vector<1x128x128xbf16>
    %24 = vector.shape_cast %23 : vector<1x128x128xbf16> to vector<128x128xbf16>
    %25 = arith.extf %24 : vector<128x128xbf16> to vector<128x128xf32>
    %cst_17 = arith.constant dense<0.000000e+00> : vector<16x128xf32>
    %26 = tpu.matmul %22, %25, %cst_17 {dimension_numbers = #tpu.dot_dimension_numbers<[1], [0], [0], [1], [0, 0, 1, 1], [], []>} : vector<16x128xf32>, vector<128x128xf32>, vector<16x128xf32> -> vector<16x128xf32>
    %cst_18 = arith.constant dense<0.000000e+00> : vector<16x128xf32>
    %27 = tpu.matmul %0, %26, %cst_18 {dimension_numbers = #tpu.dot_dimension_numbers<[1], [0], [0], [1], [0, 0, 1, 1], [], []>} : vector<16x16xf32>, vector<16x128xf32>, vector<16x128xf32> -> vector<16x128xf32>
    %28 = vector.extract_strided_slice %1 {offsets = [2, 0], sizes = [1, 128], strides = [1, 1]} : vector<8x128xf32> to vector<1x128xf32>
    %29 = vector.broadcast %28 : vector<1x128xf32> to vector<16x128xf32>
    %30 = arith.addf %27, %29 : vector<16x128xf32>
    %cst_19 = arith.constant 0.000000e+00 : f32
    %31 = vector.broadcast %cst_19 : f32 to vector<16x128xf32>
    %32 = arith.maximumf %30, %31 : vector<16x128xf32>
    %c3 = arith.constant 3 : index
    %c0_20 = arith.constant 0 : index
    %c0_21 = arith.constant 0 : index
    %33 = vector.load %arg2[%c3, %c0_20, %c0_21] : memref<4x128x128xbf16, #tpu.memory_space<vmem>>, vector<1x128x128xbf16>
    %34 = vector.shape_cast %33 : vector<1x128x128xbf16> to vector<128x128xbf16>
    %35 = arith.extf %34 : vector<128x128xbf16> to vector<128x128xf32>
    %cst_22 = arith.constant dense<0.000000e+00> : vector<16x128xf32>
    %36 = tpu.matmul %32, %35, %cst_22 {dimension_numbers = #tpu.dot_dimension_numbers<[1], [0], [0], [1], [0, 0, 1, 1], [], []>} : vector<16x128xf32>, vector<128x128xf32>, vector<16x128xf32> -> vector<16x128xf32>
    %37 = vector.extract_strided_slice %1 {offsets = [3, 0], sizes = [1, 128], strides = [1, 1]} : vector<8x128xf32> to vector<1x128xf32>
    %38 = vector.broadcast %37 : vector<1x128xf32> to vector<16x128xf32>
    %39 = arith.addf %36, %38 : vector<16x128xf32>
    %c0_23 = arith.constant 0 : index
    %c0_24 = arith.constant 0 : index
    %40 = vector.load %arg4[%c0_23, %c0_24] : memref<16x128xf32, #tpu.memory_space<vmem>>, vector<16x128xf32>
    tpu.vector_store %arg4[%c0_23, %c0_24], %39 {strides = array<i32>} : memref<16x128xf32, #tpu.memory_space<vmem>>, vector<16x128xf32>,
    return
  }
}

</mosaic_0001>

<bundles_post_ra>
// kernel: gcn_forward.1
= control target key start
LH: loop header
LB: loop body
LE: loop exit
PB: predicated region body
PF: predicated region fallthrough
CT: control target
= control target key end

     0   :  { %vm78_vm0 = vcmask 130048   ;;  %s716_s2 = inlined_call_operand.vmem [shape: bf16[4,128,128], index: 2, kind: input, shape index: {}]   ;;  %s717_s1 = inlined_call_operand.vmem [shape: f32[16,128], index: 1, kind: input, shape index: {}]   ;;  %s718_s0 = inlined_call_operand.vmem [shape: f32[16,16], index: 0, kind: input, shape index: {}]   ;;  %s719_s3 = inlined_call_operand.vmem [shape: f32[8,128], index: 3, kind: input, shape index: {}]   ;;  %s720_s4 = inlined_call_operand.vmem [shape: f32[16,128], index: 4, kind: output, shape index: {}]  }
   0x1   :  { %v525_v0 = vld [vmem:[%s716_s2 + $0x38] sm:$0xff]   ;;  %v524_v1 = vld [vmem:[%s716_s2 + $0x30] sm:$0xff]   ;;  %v523_v5 = vld [vmem:[%s716_s2 + $0x28] sm:$0xff]  }
   0x2   :  { %v422_v2 = vunpack.c.h.bf16 %v525_v0  ;;  %v421_v3 = vunpack.c.l.bf16 %v525_v0  ;;  %v418_v4 = vunpack.c.h.bf16 %v524_v1  ;;  %v417_v6 = vunpack.c.l.bf16 %v524_v1  ;;  %v522_v8 = vld [vmem:[%s716_s2 + $0x20] sm:$0xff]   ;;  %v521_v11 = vld [vmem:[%s716_s2 + $0x18] sm:$0xff]   ;;  %v520_v14 = vld [vmem:[%s716_s2 + $0x10] sm:$0xff]  }
   0x3   :  { %v414_v7 = vunpack.c.h.bf16 %v523_v5  ;;  %v413_v9 = vunpack.c.l.bf16 %v523_v5  ;;  %v410_v10 = vunpack.c.h.bf16 %v522_v8  ;;  %v409_v12 = vunpack.c.l.bf16 %v522_v8  ;;  %v519_v17 = vld [vmem:[%s716_s2 + $0x8] sm:$0xff]   ;;  %v392_v20 = vld [vmem:[%s716_s2] sm:$0xff]   ;;  %v533_v26 = vld [vmem:[%s716_s2 + $0x78] sm:$0xff]  }
   0x4   :  { %54 = vmatpush.msra.mxu0 %v422_v2  ;;  %v406_v13 = vunpack.c.h.bf16 %v521_v11  ;;  %v405_v15 = vunpack.c.l.bf16 %v521_v11  ;;  %v402_v16 = vunpack.c.h.bf16 %v520_v14  ;;  %v401_v18 = vunpack.c.l.bf16 %v520_v14  ;;  %v20_v24 = vld [vmem:[%s717_s1] sm:$0xff]  ;;  %v21_v25 = vld [vmem:[%s717_s1 + $0x8] sm:$0xff]  ;;  %v532_v27 = vld [vmem:[%s716_s2 + $0x70] sm:$0xff]  }
   0x5   :  { %v398_v19 = vunpack.c.h.bf16 %v519_v17  ;;  %v397_v21 = vunpack.c.l.bf16 %v519_v17  ;;  %v394_v22 = vunpack.c.h.bf16 %v392_v20  ;;  %v393_v23 = vunpack.c.l.bf16 %v392_v20  ;;  %v531_v31 = vld [vmem:[%s716_s2 + $0x68] sm:$0xff]   ;;  %v530_v34 = vld [vmem:[%s716_s2 + $0x60] sm:$0xff]   ;;  %v529_v38 = vld [vmem:[%s716_s2 + $0x58] sm:$0xff]  }
   0x6   :  { %55 = vmatpush.msra.mxu0 %v421_v3  ;;  %v454_v28 = vunpack.c.h.bf16 %v533_v26  ;;  %v453_v29 = vunpack.c.l.bf16 %v533_v26  ;;  %v450_v30 = vunpack.c.h.bf16 %v532_v27  ;;  %v449_v32 = vunpack.c.l.bf16 %v532_v27  ;;  %v528_v41 = vld [vmem:[%s716_s2 + $0x50] sm:$0xff]   ;;  %v527_v45 = vld [vmem:[%s716_s2 + $0x48] sm:$0xff]   ;;  %v631_v46 = vld [vmem:[%s718_s0] sm:$0xff] }
   0x7   :  { %v446_v33 = vunpack.c.h.bf16 %v531_v31  ;;  %v445_v35 = vunpack.c.l.bf16 %v531_v31  ;;  %v442_v36 = vunpack.c.h.bf16 %v530_v34  ;;  %v441_v39 = vunpack.c.l.bf16 %v530_v34  ;;  %v638_v49 = vld [vmem:[%s718_s0 + $0x8] sm:$0xff]  ;;  %v526_v51 = vld [vmem:[%s716_s2 + $0x40] sm:$0xff]   ;;  %v541_v62 = vld [vmem:[%s716_s2 + $0xb8] sm:$0xff]  }
   0x8   :  { %56 = vmatpush.msra.mxu0 %v418_v4  ;;  %143 = vmatpush.msra.mxu2 %v454_v28  ;;  %v438_v40 = vunpack.c.h.bf16 %v529_v38  ;;  %v437_v42 = vunpack.c.l.bf16 %v529_v38  ;;  %v434_v43 = vunpack.c.h.bf16 %v528_v41  ;;  %v433_v47 = vunpack.c.l.bf16 %v528_v41  ;;  %v648_v54 = vld [vmem:[%s719_s3] sm:$0xff]  ;;  %v540_v63 = vld [vmem:[%s716_s2 + $0xb0] sm:$0xff]   ;;  %v539_v3 = vld [vmem:[%s716_s2 + $0xa8] sm:$0xff]  }
   0x9   :  { %v430_v48 = vunpack.c.h.bf16 %v527_v45  ;;  %v429_v50 = vunpack.c.l.bf16 %v527_v45  ;;  %v426_v52 = vunpack.c.h.bf16 %v526_v51  ;;  %v425_v53 = vunpack.c.l.bf16 %v526_v51  ;;  %v547_v38 = vld [vmem:[%s716_s2 + $0xe8] sm:$0xff]   ;;  %v546_v41 = vld [vmem:[%s716_s2 + $0xe0] sm:$0xff]  }
   0xa   :  { %57 = vmatpush.msra.mxu0 %v417_v6  ;;  %144 = vmatpush.msra.mxu2 %v453_v29  ;;  %v77_v55 = vperm.slane %v648_v54, 0  ;;  %v486_v0 = vunpack.c.h.bf16 %v541_v62  ;;  %v485_v1 = vunpack.c.l.bf16 %v541_v62  ;;  %v482_v2 = vunpack.c.h.bf16 %v540_v63  ;;  %v538_v6 = vld [vmem:[%s716_s2 + $0xa0] sm:$0xff]  }
   0xb   :  { %v481_v4 = vunpack.c.l.bf16 %v540_v63  ;;  %v478_v5 = vunpack.c.h.bf16 %v539_v3  ;;  %v474_v8 = vunpack.c.h.bf16 %v538_v6  ;;  %v505_v45 = vunpack.c.l.bf16 %v546_v41 }
   0xc   :  { %58 = vmatpush.msra.mxu0 %v414_v7  ;;  %145 = vmatpush.msra.mxu2 %v450_v30  ;;  %v477_v7 = vunpack.c.l.bf16 %v539_v3 }
   0xe   :  { %59 = vmatpush.msra.mxu0 %v413_v9  ;;  %146 = vmatpush.msra.mxu2 %v449_v32  ;;  %v537_v9 = vld [vmem:[%s716_s2 + $0x98] sm:$0xff]  }
   0xf   :  { %v470_v11 = vunpack.c.h.bf16 %v537_v9  ;;  %v549_v32 = vld [vmem:[%s716_s2 + $0xf8] sm:$0xff]  }
  0x10   :  { %60 = vmatpush.msra.mxu0 %v410_v10  ;;  %147 = vmatpush.msra.mxu2 %v446_v33  ;;  %v473_v10 = vunpack.c.l.bf16 %v538_v6  ;;  %v518_v34 = vunpack.c.h.bf16 %v549_v32 }
  0x12   :  { %61 = vmatpush.msra.mxu0 %v409_v12  ;;  %148 = vmatpush.msra.mxu2 %v445_v35  ;;  %v536_v12 = vld [vmem:[%s716_s2 + $0x90] sm:$0xff]  }
  0x13   :  { %v466_v14 = vunpack.c.h.bf16 %v536_v12  ;;  %v465_v17 = vunpack.c.l.bf16 %v536_v12  ;;  %v548_v35 = vld [vmem:[%s716_s2 + $0xf0] sm:$0xff]  }
  0x14   :  { %62 = vmatpush.msra.mxu0 %v406_v13  ;;  %149 = vmatpush.msra.mxu2 %v442_v36  ;;  %v469_v13 = vunpack.c.l.bf16 %v537_v9  ;;  %v517_v36 = vunpack.c.l.bf16 %v549_v32 }
  0x16   :  { %63 = vmatpush.msra.mxu0 %v405_v15  ;;  %150 = vmatpush.msra.mxu2 %v441_v39  ;;  %v513_v39 = vunpack.c.l.bf16 %v548_v35 }
  0x18   :  { %64 = vmatpush.msra.mxu0 %v402_v16  ;;  %151 = vmatpush.msra.mxu2 %v438_v40  ;;  %v535_v16 = vld [vmem:[%s716_s2 + $0x88] sm:$0xff]   ;;  %v510_v40 = vunpack.c.h.bf16 %v547_v38 }
  0x19   :  { %v461_v20 = vunpack.c.l.bf16 %v535_v16 }
  0x1a   :  { %65 = vmatpush.msra.mxu0 %v401_v18  ;;  %152 = vmatpush.msra.mxu2 %v437_v42  ;;  %v462_v18 = vunpack.c.h.bf16 %v535_v16  ;;  %v509_v42 = vunpack.c.l.bf16 %v547_v38 }
  0x1c   :  { %66 = vmatpush.msra.mxu0 %v398_v19  ;;  %153 = vmatpush.msra.mxu2 %v434_v43  ;;  %v506_v43 = vunpack.c.h.bf16 %v546_v41 }
  0x1e   :  { %67 = vmatpush.msra.mxu0 %v397_v21  ;;  %154 = vmatpush.msra.mxu2 %v433_v47  ;;  %v534_v21 = vld [vmem:[%s716_s2 + $0x80] sm:$0xff]   ;;  %v544_v47 = vld [vmem:[%s716_s2 + $0xd0] sm:$0xff]  }
  0x1f   :  { %v497_v51 = vunpack.c.l.bf16 %v544_v47 }
  0x20   :  { %68 = vmatpush.msra.mxu0 %v394_v22  ;;  %155 = vmatpush.msra.mxu2 %v430_v48  ;;  %v458_v22 = vunpack.c.h.bf16 %v534_v21 }
  0x22   :  { %69 = vmatpush.msra.mxu0 %v393_v23  ;;  %156 = vmatpush.msra.mxu2 %v429_v50  ;;  %v457_v23 = vunpack.c.l.bf16 %v534_v21  ;;  %v498_v50 = vunpack.c.h.bf16 %v544_v47 }
  0x23   :  { %70 = vmatmul.f32.vlgmr.msra.gmra.mxu0 %v20_v24  ;;  %v166_v24 = vperm.slane %v648_v54, 1 }
  0x24   :  { %157 = vmatpush.msra.mxu2 %v426_v52 }
  0x26   :  { %158 = vmatpush.msra.mxu2 %v425_v53 }
  0x2b   :  { %73 = vmatmul.f32.gmra.mxu0 %v21_v25 }
  0xa0   :  { %v71_v37 = vpop.f32.mrf.mxu0 }
  0xa8   :  { %v74_v44 = vpop.f32.mrf.mxu0 }
  0xa9   :  { %99 = vmatpush.msra.mxu1 %v74_v44  ;;  %v545_v44 = vld [vmem:[%s716_s2 + $0xd8] sm:$0xff]  }
  0xaa   :  { %v501_v48 = vunpack.c.l.bf16 %v545_v44 }
  0xab   :  { %100 = vmatpush.msra.mxu1 %v71_v37  ;;  %v514_v37 = vunpack.c.h.bf16 %v548_v35 }
  0xac   :  { %337 = vmatmul.msk.f32.vlgmr.msra.gmra.mxu1 %vm78_vm0, %v631_v46 }
  0xad   :  { %225 = vmatpush.msrb.mxu1 %v486_v0 }
  0xaf   :  { %226 = vmatpush.msrb.mxu1 %v485_v1  ;;  %v307_v1 = vperm.slane %v648_v54, 3 }
  0xb1   :  { %227 = vmatpush.msrb.mxu1 %v482_v2 }
  0xb3   :  { %228 = vmatpush.msrb.mxu1 %v481_v4 }
  0xb4   :  { %338 = vmatmul.msk.f32.gmra.mxu1 %vm78_vm0, %v638_v49 }
  0xb5   :  { %229 = vmatpush.msrb.mxu1 %v478_v5 }
  0xb7   :  { %230 = vmatpush.msrb.mxu1 %v477_v7 }
  0xb9   :  { %231 = vmatpush.msrb.mxu1 %v474_v8 }
  0xbb   :  { %232 = vmatpush.msrb.mxu1 %v473_v10 }
  0xbd   :  { %233 = vmatpush.msrb.mxu1 %v470_v11 }
  0xbf   :  { %234 = vmatpush.msrb.mxu1 %v469_v13 }
  0xc1   :  { %235 = vmatpush.msrb.mxu1 %v466_v14 }
  0xc3   :  { %236 = vmatpush.msrb.mxu1 %v465_v17 }
  0xc5   :  { %237 = vmatpush.msrb.mxu1 %v462_v18 }
  0xc7   :  { %238 = vmatpush.msrb.mxu1 %v461_v20 }
  0xc9   :  { %239 = vmatpush.msrb.mxu1 %v458_v22 }
  0xcb   :  { %240 = vmatpush.msrb.mxu1 %v457_v23 }
 0x129   :  { %v102_v56 = vpop.f32.mrf.mxu1 }
 0x12a   :  { %v103_v57 = vadd.f32 %v102_v56, %v77_v55 }
 0x12c   :  { %v108_v58 = vmax.f32 %v103_v57, 0.0 }
 0x12e   :  { %159 = vmatmul.f32.vlgmr.msra.gmra.mxu2 %v108_v58  ;;  %v248_v58 = vperm.slane %v648_v54, 2 }
 0x131   :  { %v105_v59 = vpop.f32.mrf.mxu1 }
 0x132   :  { %v106_v60 = vadd.f32 %v105_v59, %v77_v55  ;;  %v542_v55 = vld [vmem:[%s716_s2 + $0xc0] sm:$0xff]  }
 0x133   :  { %v490_v56 = vunpack.c.h.bf16 %v542_v55  ;;  %v489_v57 = vunpack.c.l.bf16 %v542_v55 }
 0x134   :  { %v109_v61 = vmax.f32 %v106_v60, 0.0 }
 0x136   :  { %162 = vmatmul.f32.gmra.mxu2 %v109_v61 }
 0x1b1   :  { %v160_v15 = vpop.f32.mrf.mxu2 }
 0x1b9   :  { %v163_v19 = vpop.f32.mrf.mxu2 }
 0x1ba   :  { %181 = vmatpush.msrb.mxu0 %v163_v19  ;;  %550 = vmatpush.msrb.mxu2 %v163_v19 }
 0x1bc   :  { %182 = vmatpush.msrb.mxu0 %v160_v15  ;;  %551 = vmatpush.msrb.mxu2 %v160_v15 }
 0x1bd   :  { %355 = vmatmul.msk.f32.vlgmr.msrb.gmra.mxu0 %vm78_vm0, %v631_v46  ;;  %356 = vmatmul.msk.f32.vlgmr.msrb.gmra.mxu2 %vm78_vm0, %v638_v49 }
 0x23a   :  { %v184_v25 = vpop.f32.mrf.mxu0 }
 0x23b   :  { %v185_v26 = vadd.f32 %v184_v25, %v166_v24 }
 0x23d   :  { %v190_v27 = vmax.f32 %v185_v26, 0.0 }
 0x23f   :  { %241 = vmatmul.f32.vlgmr.msrb.gmra.mxu1 %v190_v27 }
 0x240   :  { %v187_v28 = vpop.f32.mrf.mxu2 }
 0x241   :  { %v188_v29 = vadd.f32 %v187_v28, %v166_v24 }
 0x243   :  { %v191_v30 = vmax.f32 %v188_v29, 0.0 }
 0x247   :  { %244 = vmatmul.f32.gmra.mxu1 %v191_v30 }
 0x2bc   :  { %v242_v31 = vpop.f32.mrf.mxu1 }
 0x2c4   :  { %v245_v33 = vpop.f32.mrf.mxu1 }
 0x2c5   :  { %263 = vmatpush.msra.mxu3 %v245_v33 }
 0x2c7   :  { %264 = vmatpush.msra.mxu3 %v242_v31 }
 0x2c8   :  { %373 = vmatmul.msk.f32.vlgmr.msra.gmra.mxu3 %vm78_vm0, %v631_v46  ;;  %v502_v46 = vunpack.c.h.bf16 %v545_v44 }
 0x2c9   :  { %308 = vmatpush.msrb.mxu3 %v518_v34 }
 0x2cb   :  { %309 = vmatpush.msrb.mxu3 %v517_v36 }
 0x2cd   :  { %310 = vmatpush.msrb.mxu3 %v514_v37 }
 0x2cf   :  { %311 = vmatpush.msrb.mxu3 %v513_v39 }
 0x2d0   :  { %374 = vmatmul.msk.f32.gmra.mxu3 %vm78_vm0, %v638_v49  ;;  %v543_v49 = vld [vmem:[%s716_s2 + $0xc8] sm:$0xff]  }
 0x2d1   :  { %312 = vmatpush.msrb.mxu3 %v510_v40  ;;  %v494_v52 = vunpack.c.h.bf16 %v543_v49  ;;  %v493_v53 = vunpack.c.l.bf16 %v543_v49 }
 0x2d3   :  { %313 = vmatpush.msrb.mxu3 %v509_v42 }
 0x2d5   :  { %314 = vmatpush.msrb.mxu3 %v506_v43 }
 0x2d7   :  { %315 = vmatpush.msrb.mxu3 %v505_v45 }
 0x2d9   :  { %316 = vmatpush.msrb.mxu3 %v502_v46 }
 0x2db   :  { %317 = vmatpush.msrb.mxu3 %v501_v48 }
 0x2dd   :  { %318 = vmatpush.msrb.mxu3 %v498_v50 }
 0x2df   :  { %319 = vmatpush.msrb.mxu3 %v497_v51 }
 0x2e1   :  { %320 = vmatpush.msrb.mxu3 %v494_v52 }
 0x2e3   :  { %321 = vmatpush.msrb.mxu3 %v493_v53 }
 0x2e5   :  { %322 = vmatpush.msrb.mxu3 %v490_v56 }
 0x2e7   :  { %323 = vmatpush.msrb.mxu3 %v489_v57 }
 0x34b   :  { %v266_v59 = vpop.f32.mrf.mxu3 }
 0x34c   :  { %v267_v60 = vadd.f32 %v266_v59, %v248_v58 }
 0x34e   :  { %v272_v61 = vmax.f32 %v267_v60, 0.0 }
 0x350   :  { %324 = vmatmul.f32.vlgmr.msrb.gmra.mxu3 %v272_v61 }
 0x353   :  { %v269_v62 = vpop.f32.mrf.mxu3 }
 0x354   :  { %v270_v63 = vadd.f32 %v269_v62, %v248_v58 }
 0x356   :  { %v273_v0 = vmax.f32 %v270_v63, 0.0 }
 0x358   :  { %327 = vmatmul.f32.gmra.mxu3 %v273_v0 }
 0x3d3   :  { %v325_v2 = vpop.f32.mrf.mxu3 }
 0x3d4   :  { %v326_v3 = vadd.f32 %v325_v2, %v307_v1 }
 0x3d6   :  { %331 = vst [vmem:[%s720_s4] sm:$0xff] %v326_v3 }
 0x3db   :  { %v328_v4 = vpop.f32.mrf.mxu3 }
 0x3dc   :  { %v329_v5 = vadd.f32 %v328_v4, %v307_v1 }
 0x3de   :  { %332 = vst [vmem:[%s720_s4 + $0x8] sm:$0xff] %v329_v5 }

</bundles_post_ra>
